<compile_context>
chip_gen: v7x
topology: tpu7x:2x2x1
jax: 0.10.0
libtpu: 0.0.40
codegen_flags: <defaults>
</compile_context>

<pallas_src>
import math

import jax
import jax.numpy as jnp
from jax.experimental import pallas as pl
from jax.experimental.pallas import tpu as pltpu


def _round_up(x, m):
    return (x + m - 1) // m * m


def _fused_mlp_kernel(x_ref, *rest):
    """Fused MLP: y = relu(...relu(x@w1+b1)...)@wL + bL in one kernel.

    rest = (w1, b1, w2, b2, ..., wL, bL, o_ref).  Weights are pre-transposed
    (in, out) bf16 blocks; biases are (1, out) f32 blocks.  x:(TM, in_dim),
    o:(TM, out_pad).  Intermediates stay in vregs/VMEM (no HBM round-trips).
    """
    o_ref = rest[-1]
    wb = rest[:-1]
    num_layers = len(wb) // 2

    h = x_ref[...]
    for i in range(num_layers):
        w = wb[2 * i][...]          # (k, n) bf16
        b = wb[2 * i + 1][...]      # (1, n) f32
        # bf16 MXU matmul with f32 accumulation; f32 epilogue (v5e-friendly).
        acc = jnp.dot(h.astype(w.dtype), w, preferred_element_type=jnp.float32)
        acc = acc + b
        if i < num_layers - 1:
            acc = jnp.maximum(acc, 0.0)
        h = acc
    o_ref[...] = h.astype(o_ref.dtype)


def init_mlp_params(key, input_dim, hidden_dim, output_dim, num_layers,
                    weight_dtype=jnp.bfloat16):
    """Init matching nn.Linear (uniform +-1/sqrt(fan_in)); weights are stored
    pre-transposed as (in, out) and cast to bf16 once at init.  Biases f32."""
    h = [hidden_dim] * (num_layers - 1)
    dims = list(zip([input_dim] + h, h + [output_dim]))
    params = []
    for (n_in, n_out) in dims:
        key, kw, kb = jax.random.split(key, 3)
        bound = 1.0 / math.sqrt(n_in)
        w = jax.random.uniform(kw, (n_out, n_in), jnp.float32, -bound, bound)
        b = jax.random.uniform(kb, (n_out,), jnp.float32, -bound, bound)
        params.append((w.T.astype(weight_dtype), b))   # one-time transpose/cast
    return params


def mlp_forward(x, params, *, tile_m=512):
    """Equivalent of MLP.forward for x of shape (..., input_dim)."""
    lead_shape = x.shape[:-1]
    in_dim = x.shape[-1]
    out_dim = params[-1][0].shape[-1]
    num_layers = len(params)

    x2d = x.reshape(-1, in_dim)
    m = x2d.shape[0]

    # Tile selection:
    #  * minimise pad waste: tm = ceil(m / num_tiles), sublane(8)-aligned;
    #  * force grid >= 2 when there is enough work so dimension_semantics
    #    ("parallel",) can shard across both v7x TensorCores.
    num_tiles = pl.cdiv(m, tile_m)
    if num_tiles == 1 and m >= 16:
        num_tiles = 2
    tm = _round_up(pl.cdiv(m, num_tiles), 8)
    m_pad = num_tiles * tm
    if m_pad != m:
        # Padded rows compute garbage that is sliced off below.
        x2d = jnp.pad(x2d, ((0, m_pad - m), (0, 0)))

    # Lane-dense output: pad last layer's N up to a multiple of 128 lanes so
    # the output store is a full-width vst (no masked partial stores).
    out_pad = _round_up(out_dim, 128)

    flat_args = []
    in_specs = [pl.BlockSpec((tm, in_dim), lambda i: (i, 0))]
    flops = 0
    for li, (w, b) in enumerate(params):
        k, n = w.shape
        if li == num_layers - 1 and n != out_pad:
            w = jnp.pad(w, ((0, 0), (0, out_pad - n)))   # tiny constant pad
            b = jnp.pad(b, ((0, out_pad - n),))
            n = out_pad
        flat_args.append(w)
        flat_args.append(b.reshape(1, n))
        # Full, grid-invariant blocks: block index never changes across grid
        # steps, so they stay resident in VMEM (no per-step re-DMA).
        in_specs.append(pl.BlockSpec((k, n), lambda i: (0, 0)))
        in_specs.append(pl.BlockSpec((1, n), lambda i: (0, 0)))
        flops += 2 * m_pad * k * n
    out_specs = pl.BlockSpec((tm, out_pad), lambda i: (i, 0))

    bytes_accessed = (x2d.size * x2d.dtype.itemsize
                      + m_pad * out_pad * x.dtype.itemsize
                      + sum(a.size * a.dtype.itemsize for a in flat_args))
    cost = pl.CostEstimate(flops=flops, transcendentals=0,
                           bytes_accessed=bytes_accessed)

    out2d = pl.pallas_call(
        _fused_mlp_kernel,
        out_shape=jax.ShapeDtypeStruct((m_pad, out_pad), x.dtype),
        grid=(num_tiles,),
        in_specs=in_specs,
        out_specs=out_specs,
        compiler_params=pltpu.CompilerParams(
            dimension_semantics=("parallel",),
            vmem_limit_bytes=32 * 1024 * 1024),
        cost_estimate=cost,
    )(x2d, *flat_args)

    return out2d[:m, :out_dim].reshape(*lead_shape, out_dim)


if __name__ == "__main__":
    key = jax.random.PRNGKey(0)
    k_x, k_p = jax.random.split(key)

    # Small DAB-DETR-style shapes: (num_queries=8, batch=2, d_model=32),
    # hidden_dim=32, output_dim=4 (box coords), num_layers=3.
    input_dim, hidden_dim, output_dim, num_layers = 32, 32, 4, 3
    x = jax.random.normal(k_x, (8, 2, input_dim), dtype=jnp.float32)

    params = init_mlp_params(k_p, input_dim, hidden_dim, output_dim, num_layers)

    fwd = jax.jit(mlp_forward)
    out = jax.block_until_ready(fwd(x, params))

    # Pure-JAX reference replicating the same mixed-precision math
    # (bf16 matmul inputs, f32 accumulation, f32 bias + ReLU epilogue).
    ref = x.reshape(-1, input_dim)
    for i, (w, b) in enumerate(params):          # w is (in, out) bf16
        ref = jnp.dot(ref.astype(w.dtype), w,
                      preferred_element_type=jnp.float32) + b
        if i < num_layers - 1:
            ref = jnp.maximum(ref, 0.0)
    ref = ref.astype(x.dtype).reshape(8, 2, output_dim)

    assert out.shape == (8, 2, output_dim)
    assert out.dtype == x.dtype
    assert jnp.allclose(out, ref, atol=1e-3, rtol=1e-3), (
        float(jnp.max(jnp.abs(out - ref))))

    print("KERNEL_OK")
</pallas_src>

<mosaic_0001>
module attributes {stable_mosaic.version = 11 : i64} {
  func.func @_fused_mlp_kernel(%arg0: i32, %arg1: memref<8x32xf32, #tpu.memory_space<vmem>>, %arg2: memref<32x32xbf16, #tpu.memory_space<vmem>>, %arg3: memref<1x32xf32, #tpu.memory_space<vmem>>, %arg4: memref<32x32xbf16, #tpu.memory_space<vmem>>, %arg5: memref<1x32xf32, #tpu.memory_space<vmem>>, %arg6: memref<32x128xbf16, #tpu.memory_space<vmem>>, %arg7: memref<1x128xf32, #tpu.memory_space<vmem>>, %arg8: memref<8x128xf32, #tpu.memory_space<vmem>>) attributes {dimension_semantics = [#tpu.dimension_semantics<parallel>], iteration_bounds = array<i64: 2>, scalar_prefetch = 0 : i64, scratch_operands = 0 : i64, tpu.core_type = #tpu.core_type<tc>, window_params = [{transform_indices = @transform_0, window_bounds = array<i64: 8, 32>}, {pipeline_mode = #tpu.pipeline_mode<synchronous>, transform_indices = @transform_1, window_bounds = array<i64: 32, 32>}, {pipeline_mode = #tpu.pipeline_mode<synchronous>, transform_indices = @transform_2, window_bounds = array<i64: 1, 32>}, {pipeline_mode = #tpu.pipeline_mode<synchronous>, transform_indices = @transform_3, window_bounds = array<i64: 32, 32>}, {pipeline_mode = #tpu.pipeline_mode<synchronous>, transform_indices = @transform_4, window_bounds = array<i64: 1, 32>}, {pipeline_mode = #tpu.pipeline_mode<synchronous>, transform_indices = @transform_5, window_bounds = array<i64: 32, 128>}, {pipeline_mode = #tpu.pipeline_mode<synchronous>, transform_indices = @transform_6, window_bounds = array<i64: 1, 128>}, {transform_indices = @transform_7, window_bounds = array<i64: 8, 128>}]} {
    %c0 = arith.constant 0 : index
    %c0_0 = arith.constant 0 : index
    %0 = vector.load %arg1[%c0, %c0_0] : memref<8x32xf32, #tpu.memory_space<vmem>>, vector<8x32xf32>
    %c0_1 = arith.constant 0 : index
    %c0_2 = arith.constant 0 : index
    %1 = vector.load %arg2[%c0_1, %c0_2] : memref<32x32xbf16, #tpu.memory_space<vmem>>, vector<32x32xbf16>
    %c0_3 = arith.constant 0 : index
    %c0_4 = arith.constant 0 : index
    %2 = vector.load %arg3[%c0_3, %c0_4] : memref<1x32xf32, #tpu.memory_space<vmem>>, vector<1x32xf32>
    %3 = arith.truncf %0 : vector<8x32xf32> to vector<8x32xbf16>
    %cst = arith.constant dense<0.000000e+00> : vector<8x32xf32>
    %4 = tpu.matmul %3, %1, %cst {dimension_numbers = #tpu.dot_dimension_numbers<[1], [0], [0], [1], [0, 0, 1, 1], [], []>} : vector<8x32xbf16>, vector<32x32xbf16>, vector<8x32xf32> -> vector<8x32xf32>
    %5 = vector.broadcast %2 : vector<1x32xf32> to vector<8x32xf32>
    %6 = arith.addf %4, %5 : vector<8x32xf32>
    %cst_5 = arith.constant 0.000000e+00 : f32
    %7 = vector.broadcast %cst_5 : f32 to vector<8x32xf32>
    %8 = arith.maximumf %6, %7 : vector<8x32xf32>
    %c0_6 = arith.constant 0 : index
    %c0_7 = arith.constant 0 : index
    %9 = vector.load %arg4[%c0_6, %c0_7] : memref<32x32xbf16, #tpu.memory_space<vmem>>, vector<32x32xbf16>
    %c0_8 = arith.constant 0 : index
    %c0_9 = arith.constant 0 : index
    %10 = vector.load %arg5[%c0_8, %c0_9] : memref<1x32xf32, #tpu.memory_space<vmem>>, vector<1x32xf32>
    %11 = arith.truncf %8 : vector<8x32xf32> to vector<8x32xbf16>
    %cst_10 = arith.constant dense<0.000000e+00> : vector<8x32xf32>
    %12 = tpu.matmul %11, %9, %cst_10 {dimension_numbers = #tpu.dot_dimension_numbers<[1], [0], [0], [1], [0, 0, 1, 1], [], []>} : vector<8x32xbf16>, vector<32x32xbf16>, vector<8x32xf32> -> vector<8x32xf32>
    %13 = vector.broadcast %10 : vector<1x32xf32> to vector<8x32xf32>
    %14 = arith.addf %12, %13 : vector<8x32xf32>
    %cst_11 = arith.constant 0.000000e+00 : f32
    %15 = vector.broadcast %cst_11 : f32 to vector<8x32xf32>
    %16 = arith.maximumf %14, %15 : vector<8x32xf32>
    %c0_12 = arith.constant 0 : index
    %c0_13 = arith.constant 0 : index
    %17 = vector.load %arg6[%c0_12, %c0_13] : memref<32x128xbf16, #tpu.memory_space<vmem>>, vector<32x128xbf16>
    %c0_14 = arith.constant 0 : index
    %c0_15 = arith.constant 0 : index
    %18 = vector.load %arg7[%c0_14, %c0_15] : memref<1x128xf32, #tpu.memory_space<vmem>>, vector<1x128xf32>
    %19 = arith.truncf %16 : vector<8x32xf32> to vector<8x32xbf16>
    %cst_16 = arith.constant dense<0.000000e+00> : vector<8x128xf32>
    %20 = tpu.matmul %19, %17, %cst_16 {dimension_numbers = #tpu.dot_dimension_numbers<[1], [0], [0], [1], [0, 0, 1, 1], [], []>} : vector<8x32xbf16>, vector<32x128xbf16>, vector<8x128xf32> -> vector<8x128xf32>
    %21 = vector.broadcast %18 : vector<1x128xf32> to vector<8x128xf32>
    %22 = arith.addf %20, %21 : vector<8x128xf32>
    %c0_17 = arith.constant 0 : index
    %c0_18 = arith.constant 0 : index
    %23 = vector.load %arg8[%c0_17, %c0_18] : memref<8x128xf32, #tpu.memory_space<vmem>>, vector<8x128xf32>
    tpu.vector_store %arg8[%c0_17, %c0_18], %22 {strides = array<i32>} : memref<8x128xf32, #tpu.memory_space<vmem>>, vector<8x128xf32>,
    return
  }
  func.func @transform_0(%arg0: i32) -> (i32, i32) {
    %c0_i32 = arith.constant 0 : i32
    %c0_i32_0 = arith.constant 0 : i32
    return %arg0, %c0_i32 : i32, i32
  }
  func.func @transform_1(%arg0: i32) -> (i32, i32) {
    %c0_i32 = arith.constant 0 : i32
    %c0_i32_0 = arith.constant 0 : i32
    %c0_i32_1 = arith.constant 0 : i32
    return %c0_i32, %c0_i32_0 : i32, i32
  }
  func.func @transform_2(%arg0: i32) -> (i32, i32) {
    %c0_i32 = arith.constant 0 : i32
    %c0_i32_0 = arith.constant 0 : i32
    %c0_i32_1 = arith.constant 0 : i32
    return %c0_i32, %c0_i32_0 : i32, i32
  }
  func.func @transform_3(%arg0: i32) -> (i32, i32) {
    %c0_i32 = arith.constant 0 : i32
    %c0_i32_0 = arith.constant 0 : i32
    %c0_i32_1 = arith.constant 0 : i32
    return %c0_i32, %c0_i32_0 : i32, i32
  }
  func.func @transform_4(%arg0: i32) -> (i32, i32) {
    %c0_i32 = arith.constant 0 : i32
    %c0_i32_0 = arith.constant 0 : i32
    %c0_i32_1 = arith.constant 0 : i32
    return %c0_i32, %c0_i32_0 : i32, i32
  }
  func.func @transform_5(%arg0: i32) -> (i32, i32) {
    %c0_i32 = arith.constant 0 : i32
    %c0_i32_0 = arith.constant 0 : i32
    %c0_i32_1 = arith.constant 0 : i32
    return %c0_i32, %c0_i32_0 : i32, i32
  }
  func.func @transform_6(%arg0: i32) -> (i32, i32) {
    %c0_i32 = arith.constant 0 : i32
    %c0_i32_0 = arith.constant 0 : i32
    %c0_i32_1 = arith.constant 0 : i32
    return %c0_i32, %c0_i32_0 : i32, i32
  }
  func.func @transform_7(%arg0: i32) -> (i32, i32) {
    %c0_i32 = arith.constant 0 : i32
    %c0_i32_0 = arith.constant 0 : i32
    return %arg0, %c0_i32 : i32, i32
  }
}

</mosaic_0001>

<bundles_post_ra>
// kernel: mlp_forward.1
= control target key start
LH: loop header
LB: loop body
LE: loop exit
PB: predicated region body
PF: predicated region fallthrough
CT: control target
= control target key end

     0   :  { %s654_s24 = smov 0   ;;  %s708_s0 = inlined_call_operand.vmem [shape: f32[16,32], index: 0, kind: input, shape index: {}]   ;;  %s709_s1 = inlined_call_operand.vmem [shape: bf16[32,32], index: 1, kind: input, shape index: {}]   ;;  %s710_s2 = inlined_call_operand.vmem [shape: f32[1,32], index: 2, kind: input, shape index: {}]   ;;  %s711_s3 = inlined_call_operand.vmem [shape: bf16[32,32], index: 3, kind: input, shape index: {}]   ;;  %s712_s4 = inlined_call_operand.vmem [shape: f32[1,32], index: 4, kind: input, shape index: {}]   ;;  %s713_s5 = inlined_call_operand.vmem [shape: bf16[32,128], index: 5, kind: input, shape index: {}]   ;;  %s714_s6 = inlined_call_operand.vmem [shape: f32[1,128], index: 6, kind: input, shape index: {}]   ;;  %s715_s7 = inlined_call_operand.vmem [shape: f32[16,128], index: 7, kind: output, shape index: {}]  }
   0x1 LB: > { %s534_s25 = sadd.s32 4294967295, %s610_s24   ;;  %p538_p0 = scmp.ge.s32.totalorder %s610_s24, 1  ;;  %s610_s24 = sphi %s654_s24, %s17_s24  }
   0x2   : > { %p236_p1 = scmp.lt.s32.totalorder %s610_s24, 3 }
   0x4   : > { %p237_p2 = pnand %p538_p0, %p236_p1 }
   0x5   : > { %v598_v0 = vld [vmem:[%s709_s1] sm:$0xff] (!%p237_p2)   ;;  %v612_v1 = vmov (!%p237_p2), 0.0   ;;  %v599_v2 = vld [vmem:[%s709_s1 + $0x8] sm:$0xff] (!%p237_p2)   ;;  %vm613_vm0 = vmmov (!%p237_p2), 0   ;;  %p266_p3 = scmp.lt.s32.totalorder (!%p237_p2), %s534_s25, 1  ;;  %vm300_vm1 = vcmask (!%p237_p2), 261120  }
   0x6   : > { %240 = sbr.rel (%p237_p2) target bundleno = 670 (0x29e), region = 48  ;;  %564 = vmatprep.subr.bf16.mxu0 (!%p237_p2), %v612_v1  ;;  %572 = vmatprep.subr.bf16.mxu1 (!%p237_p2), %v612_v1  ;;  %v600_v5 = vld [vmem:[%s711_s3] sm:$0xff] (!%p237_p2)   ;;  %v601_v6 = vld [vmem:[%s711_s3 + $0x8] sm:$0xff] (!%p237_p2)  }
   0x7   : > { %565 = vmatpush3.bf16.msra.mxu0 (!%p237_p2), %v598_v0  ;;  %568 = vmatprep.mubr.msk.bf16.mxu0 (!%p237_p2), %vm613_vm0, %v612_v1  ;;  %v602_v7 = vld [vmem:[%s713_s5] sm:$0xff] (!%p237_p2)   ;;  %v603_v16 = vld [vmem:[%s713_s5 + $0x8] sm:$0xff] (!%p237_p2)  }
   0x8   : > { %566 = vmatprep.subr.bf16.mxu0 (!%p237_p2), %v612_v1  ;;  %576 = vmatprep.mubr.msk.bf16.mxu1 (!%p237_p2), %vm613_vm0, %v612_v1  ;;  %v541_v8 = vld [vmem:[%s710_s2] ss:$0 sm:$0xff] (!%p237_p2) }
   0x9   : > { %573 = vmatpush3.bf16.msra.mxu1 (!%p237_p2), %v600_v5  ;;  %v545_v17 = vld [vmem:[%s712_s4] ss:$0 sm:$0xff] (!%p237_p2) }
   0xa   : > { %574 = vmatprep.subr.bf16.mxu1 (!%p237_p2), %v612_v1  ;;  %v549_v25 = vld [vmem:[%s714_s6] ss:$0 sm:$0xff] (!%p237_p2) }
   0xb   : > { %567 = vmatpush3.bf16.msra.mxu0 (!%p237_p2), %v599_v2 }
   0xc   : > { %580 = vmatprep.subr.bf16.mxu0 (!%p237_p2), %v612_v1 }
   0xd   : > { %s717_s25 = smov (!%p266_p3, %s534_s25), 1  ;;  %575 = vmatpush3.bf16.msra.mxu1 %v601_v6 }
   0xe   : > { %s539_s30 = sshll.u32 %s717_s25, 3 }
   0xf   : > { %s269_s10 = scalar_lea.vmem %s708_s0, %s539_s30  ;;  %s273_s29 = scalar_lea.vmem %s715_s7, %s539_s30 }
  0x10   : > { %v275_v3 = vld [vmem:[%s269_s10] sm:$0xff] }
  0x11   : > { %v281_v4 = vpack.c.bf16 %v275_v3, %v275_v3 }
  0x13   : > { %569 = vmatmul.mubr.msk.bf16.vlgmr.msra.gmra.mrb[0].mxu0 %vm300_vm1, %v281_v4 }
  0x14   : > { %584 = vmatprep.mubr.msk.bf16.mxu0 %vm613_vm0, %v612_v1  ;;  %581 = vmatpush3.bf16.msra.mxu0 %v602_v7 }
  0x15   : > { %582 = vmatprep.subr.bf16.mxu0 %v612_v1 }
  0x18   : > { %583 = vmatpush3.bf16.msra.mxu0 %v603_v16 }
  0xe6   : > { %v338_v9 = vpop.f32.mrb[0].mxu0 }
  0xe7   : > { %v339_v10 = vadd.f32 %v541_v8, %v338_v9  ;;  %v570_v11 = vpop.f32.mrb[1].mxu0 }
  0xe8   : > { %v341_v12 = vpop.f32.mrb[2].mxu0 }
  0xe9   : > { %v344_v13 = vmax.f32 %v339_v10, 0.0  ;;  %v571_v14 = vpop.f32.mrb[3].mxu0 }
  0xeb   : > { %v350_v15 = vpack.c.bf16 %v344_v13, %v344_v13 }
  0xed   : > { %577 = vmatmul.mubr.msk.bf16.vlgmr.msra.gmra.mrb[0].mxu1 %vm300_vm1, %v350_v15 }
 0x1c0   : > { %v406_v18 = vpop.f32.mrb[0].mxu1 }
 0x1c1   : > { %v407_v19 = vadd.f32 %v545_v17, %v406_v18  ;;  %v578_v20 = vpop.f32.mrb[1].mxu1 }
 0x1c2   : > { %v409_v21 = vpop.f32.mrb[2].mxu1 }
 0x1c3   : > { %v412_v22 = vmax.f32 %v407_v19, 0.0  ;;  %v579_v23 = vpop.f32.mrb[3].mxu1 }
 0x1c5   : > { %v418_v24 = vpack.c.bf16 %v412_v22, %v412_v22 }
 0x1c7   : > { %585 = vmatmul.mubr.msk.bf16.vlgmr.msra.gmra.mrb[4].mxu0 %vm300_vm1, %v418_v24 }
 0x29a   : > { %v474_v26 = vpop.f32.mrb[4].mxu0 }
 0x29b   : > { %v475_v27 = vadd.f32 %v549_v25, %v474_v26  ;;  %v586_v28 = vpop.f32.mrb[5].mxu0 }
 0x29c   : > { %v477_v29 = vpop.f32.mrb[6].mxu0 }
 0x29d   : > { %480 = vst [vmem:[%s273_s29] sm:$0xff] %v475_v27  ;;  %v587_v30 = vpop.f32.mrb[7].mxu0 }
 0x29e PF: > { %s17_s24 = sadd.s32 1, %s610_s24  }
 0x29f   : > { %p14_p4 = scmp.ge.s32.totalorder %s17_s24, 4  }
 0x2a1   :  { %16 = sbr.rel (!%p14_p4) target bundleno = 1 (0x1), region = 78 }

</bundles_post_ra>
